<compile_context>
chip_gen: v5e
topology: v5e:2x2
jax: 0.10.0
libtpu: 0.0.40
codegen_flags: <defaults>
</compile_context>

<pallas_src>
import functools

import numpy as np
import jax
import jax.numpy as jnp
from jax import lax
from jax.experimental import pallas as pl
from jax.experimental.pallas import tpu as pltpu

EPS = 1e-5                       # PyTorch BatchNorm2d default
VMEM_LIMIT = 32 * 1024 * 1024    # explicit scoped-VMEM cap (safe on v5e/v6e/v7x)


# ---------------------------------------------------------------------------
# Pallas kernels
# ---------------------------------------------------------------------------
def _fc_kernel(z_ref, w_ref, b_ref, o_ref):
    # z: (B, latent) f32   w: (latent, flat) bf16   b: (1, flat) f32
    o_ref[...] = (
        jnp.dot(z_ref[...].astype(jnp.bfloat16), w_ref[...],
                preferred_element_type=jnp.float32)
        + b_ref[...]
    )


def _deconv_phase_kernel(x_ref, w_ref, b_ref, g_ref, bt_ref, o_ref, *,
                         win, hb, wb, cout, ss, apply_relu, apply_bn):
    """Phase-combined ConvTranspose2d: one MXU matmul producing all s*s output
    phases, fused with bias + ReLU + training-mode BatchNorm.

    x: (nb, hb+win-1, wb+win-1, Cin) f32 (raw input + tiny halo, NOT dilated)
    w: (win*win*Cin, ss*Cout) bf16      b/g/bt: (1, ss*Cout) f32
    o: (nb*hb*wb, ss*Cout) f32  -- row (b,obh,obw), lane (rh,rw,cout)
    """
    nb = x_ref.shape[0]
    cin = x_ref.shape[3]
    rows = nb * hb * wb

    x = x_ref[...]
    # in-register im2col: win*win shifted views -> (rows, win*win*Cin)
    parts = []
    for dh in range(win):
        for dw in range(win):
            parts.append(x[:, dh:dh + hb, dw:dw + wb, :].reshape(rows, cin))
    patches = parts[0] if len(parts) == 1 else jnp.concatenate(parts, axis=1)

    # single wide matmul on the MXU (bf16 operands, f32 accumulation)
    acc = jnp.dot(patches.astype(jnp.bfloat16), w_ref[...],
                  preferred_element_type=jnp.float32)
    acc = acc + b_ref[...]

    if apply_relu:
        acc = jnp.maximum(acc, 0.0)

    if apply_bn:
        # one-pass batch statistics (sum / sum-of-squares), per channel:
        # reduce over rows, then fold the s*s phase groups along lanes.
        n = float(rows * ss)
        s1 = jnp.sum(acc, axis=0, keepdims=True)        # (1, ss*Cout)
        s2 = jnp.sum(acc * acc, axis=0, keepdims=True)  # (1, ss*Cout)
        m1 = s1[:, 0:cout]
        m2 = s2[:, 0:cout]
        for j in range(1, ss):
            m1 = m1 + s1[:, j * cout:(j + 1) * cout]
            m2 = m2 + s2[:, j * cout:(j + 1) * cout]
        mean = m1 / n
        var = jnp.maximum(m2 / n - mean * mean, 0.0)
        inv = lax.rsqrt(var + EPS)
        if ss > 1:
            mean = jnp.concatenate([mean] * ss, axis=1)
            inv = jnp.concatenate([inv] * ss, axis=1)
        acc = (acc - mean) * inv * g_ref[...] + bt_ref[...]

    o_ref[...] = acc


# ---------------------------------------------------------------------------
# pallas_call wrappers
# ---------------------------------------------------------------------------
def _vmem():
    return pl.BlockSpec(memory_space=pltpu.MemorySpace.VMEM)


def fc_forward(z, w_kernel_T, b_row):
    B = z.shape[0]
    flat = w_kernel_T.shape[1]
    return pl.pallas_call(
        _fc_kernel,
        out_shape=jax.ShapeDtypeStruct((B, flat), jnp.float32),
        in_specs=[_vmem()] * 3,
        out_specs=_vmem(),
        compiler_params=pltpu.CompilerParams(vmem_limit_bytes=VMEM_LIMIT),
    )(z, w_kernel_T, b_row)


def deconv_layer(x_nhwc, prm, *, apply_relu, apply_bn):
    B, H, W, Cin = x_nhwc.shape
    K, s, p = prm['k'], prm['s'], prm['p']
    win, dmin, dmax = prm['win'], prm['dmin'], prm['dmax']
    ss, Cout = prm['ss'], prm['cout']

    Ho = (H - 1) * s - 2 * p + K
    Wo = (W - 1) * s - 2 * p + K
    Hb = -(-Ho // s)
    Wb = -(-Wo // s)
    if apply_bn:
        # batch stats are computed on the packed (crop-free) layout
        assert Hb * s == Ho and Wb * s == Wo

    # tiny halo padding of the RAW input (no zero-dilation anywhere)
    pad_lo = -dmin
    pad_hi_h = max(0, (Hb - 1 + dmax) - (H - 1))
    pad_hi_w = max(0, (Wb - 1 + dmax) - (W - 1))
    Hp, Wp = Hb + win - 1, Wb + win - 1
    xp = jnp.pad(x_nhwc, ((0, 0), (pad_lo, pad_hi_h), (pad_lo, pad_hi_w), (0, 0)))
    xp = xp[:, :Hp, :Wp, :]

    CK = win * win * Cin
    ssC = ss * Cout
    kern = functools.partial(_deconv_phase_kernel, win=win, hb=Hb, wb=Wb,
                             cout=Cout, ss=ss,
                             apply_relu=apply_relu, apply_bn=apply_bn)
    out_shape = jax.ShapeDtypeStruct((B * Hb * Wb, ssC), jnp.float32)
    args = (xp, prm['w_comb'], prm['b_t'], prm['g_t'], prm['bt_t'])

    if apply_bn:
        # training-mode BN needs the whole batch in one step -> no grid
        out2d = pl.pallas_call(
            kern, out_shape=out_shape,
            in_specs=[_vmem()] * 5, out_specs=_vmem(),
            compiler_params=pltpu.CompilerParams(vmem_limit_bytes=VMEM_LIMIT),
        )(*args)
    else:
        # batch-gridded, parallel axis: auto double-buffered DMA, 2-TC on v7x
        out2d = pl.pallas_call(
            kern, out_shape=out_shape,
            grid=(B,),
            in_specs=[
                pl.BlockSpec((1, Hp, Wp, Cin), lambda b: (b, 0, 0, 0)),
                pl.BlockSpec((CK, ssC), lambda b: (0, 0)),
                pl.BlockSpec((1, ssC), lambda b: (0, 0)),
                pl.BlockSpec((1, ssC), lambda b: (0, 0)),
                pl.BlockSpec((1, ssC), lambda b: (0, 0)),
            ],
            out_specs=pl.BlockSpec((Hb * Wb, ssC), lambda b: (b, 0)),
            compiler_params=pltpu.CompilerParams(
                dimension_semantics=("parallel",),
                vmem_limit_bytes=VMEM_LIMIT),
        )(*args)

    # depth-to-space interleave of the s*s phases (pure data movement, in JAX)
    y = out2d.reshape(B, Hb, Wb, s, s, Cout).transpose(0, 1, 3, 2, 4, 5)
    y = y.reshape(B, Hb * s, Wb * s, Cout)[:, :Ho, :Wo, :]
    return y


# ---------------------------------------------------------------------------
# Init-time weight precompute (phase-combined ConvTranspose weight)
# ---------------------------------------------------------------------------
def _precompute_deconv(w_t, bias, gamma, beta, K, s, p):
    """w_t: PyTorch ConvTranspose2d weight (Cin, Cout, K, K)."""
    Cin, Cout = int(w_t.shape[0]), int(w_t.shape[1])
    pad = K - 1 - p
    assert pad >= 0, "padding > kernel_size - 1 not supported"
    # equivalent direct-conv weight (spatial flip, HWIO)
    wf = np.asarray(jnp.flip(w_t, axis=(2, 3)).transpose(2, 3, 0, 1))  # (K,K,Cin,Cout)

    ds = [(r + k - pad) // s
          for r in range(s) for k in range(K) if (r + k - pad) % s == 0]
    dmin, dmax = min(ds), max(ds)
    win = dmax - dmin + 1

    wc = np.zeros((win, win, Cin, s, s, Cout), np.float32)
    for rh in range(s):
        for kh in range(K):
            if (rh + kh - pad) % s:
                continue
            dh = (rh + kh - pad) // s - dmin
            for rw in range(s):
                for kw in range(K):
                    if (rw + kw - pad) % s:
                        continue
                    dw = (rw + kw - pad) // s - dmin
                    wc[dh, dw, :, rh, rw, :] = wf[kh, kw]

    ss = s * s
    return dict(
        w_comb=jnp.asarray(wc.reshape(win * win * Cin, ss * Cout), jnp.bfloat16),
        b_t=jnp.asarray(np.tile(np.asarray(bias), ss).reshape(1, ss * Cout), jnp.float32),
        g_t=jnp.asarray(np.tile(np.asarray(gamma), ss).reshape(1, ss * Cout), jnp.float32),
        bt_t=jnp.asarray(np.tile(np.asarray(beta), ss).reshape(1, ss * Cout), jnp.float32),
        dmin=dmin, dmax=dmax, win=win, ss=ss, cout=Cout, k=K, s=s, p=p)


# ---------------------------------------------------------------------------
# ConvDecoder
# ---------------------------------------------------------------------------
class ConvDecoderPallas:
    def __init__(self, output_channels, output_shape, hidden_channels,
                 kernel_sizes, strides, paddings, latent_dim,
                 batch_norm=True, key=None):
        assert len(hidden_channels) == len(kernel_sizes) == len(strides) == len(paddings)
        if key is None:
            key = jax.random.PRNGKey(0)
        h, w = output_shape
        for k, s, p in zip(reversed(kernel_sizes), reversed(strides), reversed(paddings)):
            h = (h + 2 * p - k) // s + 1
            w = (w + 2 * p - k) // s + 1
        self.init_h, self.init_w = h, w
        self.init_channels = hidden_channels[0]
        flat = self.init_channels * h * w

        n_layers = len(hidden_channels)
        keys = iter(jax.random.split(key, 2 + 2 * n_layers))

        def u(k, shape, fan_in):
            bound = 1.0 / float(fan_in) ** 0.5
            return jax.random.uniform(k, shape, jnp.float32, -bound, bound)

        # nn.Linear(latent_dim, flat): weight (flat, latent), bias (flat,)
        self.w_fc = u(next(keys), (flat, latent_dim), latent_dim)
        self.b_fc = u(next(keys), (flat,), latent_dim)
        # fold the NCHW->NHWC transpose into a row permutation of the fc weight
        idx = np.arange(flat).reshape(self.init_channels, h, w)
        perm = idx.transpose(1, 2, 0).reshape(flat)
        self.w_fc_kernel = jnp.asarray(self.w_fc[perm, :].T, jnp.bfloat16)  # (latent, flat)
        self.b_fc_kernel = self.b_fc[perm].reshape(1, flat)                 # f32

        self.layers = []
        in_c = hidden_channels[0]
        cfgs = list(zip(hidden_channels[:-1], kernel_sizes[:-1],
                        strides[:-1], paddings[:-1]))
        for out_c, k, s, p in cfgs:
            fan = out_c * k * k
            wgt = u(next(keys), (in_c, out_c, k, k), fan)
            bia = u(next(keys), (out_c,), fan)
            gam = jnp.ones((out_c,), jnp.float32)
            bet = jnp.zeros((out_c,), jnp.float32)
            self.layers.append(dict(
                w=wgt, b=bia, gamma=gam, beta=bet, k=k, s=s, p=p,
                relu=True, bn=batch_norm,
                prm=_precompute_deconv(wgt, bia, gam, bet, k, s, p)))
            in_c = out_c
        k, s, p = kernel_sizes[-1], strides[-1], paddings[-1]
        fan = output_channels * k * k
        wgt = u(next(keys), (in_c, output_channels, k, k), fan)
        bia = u(next(keys), (output_channels,), fan)
        gam = jnp.ones((output_channels,), jnp.float32)
        bet = jnp.zeros((output_channels,), jnp.float32)
        self.layers.append(dict(
            w=wgt, b=bia, gamma=gam, beta=bet, k=k, s=s, p=p,
            relu=False, bn=False,
            prm=_precompute_deconv(wgt, bia, gam, bet, k, s, p)))

    def __call__(self, z):
        B = z.shape[0]
        h = fc_forward(z, self.w_fc_kernel, self.b_fc_kernel)   # already NHWC-ordered
        x = h.reshape(B, self.init_h, self.init_w, self.init_channels)
        for lay in self.layers:
            x = deconv_layer(x, lay['prm'],
                             apply_relu=lay['relu'], apply_bn=lay['bn'])
        return jnp.transpose(x, (0, 3, 1, 2))   # NCHW, matching the PyTorch module


# ---------------------------------------------------------------------------
# Pure-JAX reference (XLA dilated conv) for validation
# ---------------------------------------------------------------------------
def _ref_forward(dec, z):
    B = z.shape[0]
    h = jnp.dot(z.astype(jnp.bfloat16), dec.w_fc.T.astype(jnp.bfloat16),
                preferred_element_type=jnp.float32) + dec.b_fc
    h = h.reshape(B, dec.init_channels, dec.init_h, dec.init_w)
    x = jnp.transpose(h, (0, 2, 3, 1))
    for lay in dec.layers:
        K, s, p = lay['k'], lay['s'], lay['p']
        w_hwio = jnp.flip(lay['w'], axis=(2, 3)).transpose(2, 3, 0, 1).astype(jnp.bfloat16)
        x = lax.conv_general_dilated(
            x.astype(jnp.bfloat16), w_hwio, window_strides=(1, 1),
            padding=[(K - 1 - p, K - 1 - p)] * 2,
            lhs_dilation=(s, s),
            dimension_numbers=('NHWC', 'HWIO', 'NHWC'),
            preferred_element_type=jnp.float32)
        x = x + lay['b'].reshape(1, 1, 1, -1)
        if lay['relu']:
            x = jnp.maximum(x, 0.0)
        if lay['bn']:
            mean = jnp.mean(x, axis=(0, 1, 2), keepdims=True)
            var = jnp.mean((x - mean) ** 2, axis=(0, 1, 2), keepdims=True)
            x = (x - mean) * lax.rsqrt(var + EPS)
            x = x * lay['gamma'].reshape(1, 1, 1, -1) + lay['beta'].reshape(1, 1, 1, -1)
    return jnp.transpose(x, (0, 3, 1, 2))


if __name__ == "__main__":
    B, latent_dim = 2, 32
    output_channels = 3
    output_shape = (16, 16)
    hidden_channels = [8, 8]
    kernel_sizes = [4, 4]
    strides = [2, 2]
    paddings = [1, 1]

    root = jax.random.PRNGKey(0)
    k_params, k_z = jax.random.split(root)

    dec = ConvDecoderPallas(output_channels, output_shape, hidden_channels,
                            kernel_sizes, strides, paddings, latent_dim,
                            batch_norm=True, key=k_params)

    z = jax.random.normal(k_z, (B, latent_dim), jnp.float32)

    out = jax.block_until_ready(dec(z))
    assert out.shape == (B, output_channels, *output_shape), out.shape

    ref = jax.block_until_ready(_ref_forward(dec, z))
    err = float(jnp.max(jnp.abs(out - ref)))
    assert jnp.allclose(out, ref, atol=2e-2, rtol=2e-2), err

    print("KERNEL_OK")
</pallas_src>

<mosaic_0001>
module attributes {stable_mosaic.version = 11 : i64} {
  func.func @_fc_kernel(%arg0: memref<2x32xf32, #tpu.memory_space<vmem>>, %arg1: memref<32x128xbf16, #tpu.memory_space<vmem>>, %arg2: memref<1x128xf32, #tpu.memory_space<vmem>>, %arg3: memref<2x128xf32, #tpu.memory_space<vmem>>) attributes {dimension_semantics = [], scalar_prefetch = 0 : i64, scratch_operands = 0 : i64, tpu.core_type = #tpu.core_type<tc>} {
    %c0 = arith.constant 0 : index
    %c0_0 = arith.constant 0 : index
    %0 = vector.load %arg0[%c0, %c0_0] : memref<2x32xf32, #tpu.memory_space<vmem>>, vector<2x32xf32>
    %1 = arith.truncf %0 : vector<2x32xf32> to vector<2x32xbf16>
    %c0_1 = arith.constant 0 : index
    %c0_2 = arith.constant 0 : index
    %2 = vector.load %arg1[%c0_1, %c0_2] : memref<32x128xbf16, #tpu.memory_space<vmem>>, vector<32x128xbf16>
    %cst = arith.constant dense<0.000000e+00> : vector<2x128xf32>
    %3 = tpu.matmul %1, %2, %cst {dimension_numbers = #tpu.dot_dimension_numbers<[1], [0], [0], [1], [0, 0, 1, 1], [], []>} : vector<2x32xbf16>, vector<32x128xbf16>, vector<2x128xf32> -> vector<2x128xf32>
    %c0_3 = arith.constant 0 : index
    %c0_4 = arith.constant 0 : index
    %4 = vector.load %arg2[%c0_3, %c0_4] : memref<1x128xf32, #tpu.memory_space<vmem>>, vector<1x128xf32>
    %5 = vector.broadcast %4 : vector<1x128xf32> to vector<2x128xf32>
    %6 = arith.addf %3, %5 : vector<2x128xf32>
    %c0_5 = arith.constant 0 : index
    %c0_6 = arith.constant 0 : index
    %7 = vector.load %arg3[%c0_5, %c0_6] : memref<2x128xf32, #tpu.memory_space<vmem>>, vector<2x128xf32>
    tpu.vector_store %arg3[%c0_5, %c0_6], %6 {strides = array<i32>} : memref<2x128xf32, #tpu.memory_space<vmem>>, vector<2x128xf32>,
    return
  }
}

</mosaic_0001>

<bundles_post_ra>
// kernel: tpu_custom_call.1
= control target key start
LH: loop header
LB: loop body
LE: loop exit
PB: predicated region body
PF: predicated region fallthrough
CT: control target
= control target key end

     0   :  { %8 = vsyncpa [#allocation3], 0  ;;  %s236_s0 = inlined_call_operand.hbm [shape: f32[2,32], index: 0, kind: input, shape index: {}]   ;;  %s237_s1 = inlined_call_operand.hbm [shape: bf16[32,128], index: 1, kind: input, shape index: {}]   ;;  %s238_s2 = inlined_call_operand.vmem [shape: f32[1,128], index: 2, kind: input, shape index: {}]   ;;  %s239_s3 = inlined_call_operand.hbm [shape: f32[2,128], index: 3, kind: output, shape index: {}]  }
   0x1   :  { %9 = vsyncpa [#allocation6], 0 }
   0x2   :  { %10 = vsyncpa [#allocation4], 0  ;;  %s16_s14 = sshll.u32 %s236_s0, 4  ;;  %s199_s15 = smov [#allocation2]   ;;  %s17_s14 = int_to_ptr.hbm [resolvable:$true] %s16_s14 }
   0x3   :  { %s18_s16 = sshll.u32 %s199_s15, 4  ;;  %s26_s19 = sshll.u32 %s237_s1, 4  ;;  %s19_s16 = int_to_ptr.vmem [resolvable:$true] %s18_s16  ;;  %s27_s19 = int_to_ptr.hbm [resolvable:$true] %s26_s19 }
   0x4   :  { %21 = dma.hbm_to_vmem [thread:$0]  %s17_s14, 32, %s19_s16, [#allocation3]  }
   0x5   :  { %s200_s20 = smov [#allocation5]   ;;  %s201_s22 = smov 64  }
   0x6   :  { %s28_s21 = sshll.u32 %s200_s20, 4  ;;  %s202_s23 = smov 4   ;;  %s29_s21 = int_to_ptr.vmem [resolvable:$true] %s28_s21 }
   0x7   :  { %34 = dma.hbm_to_vmem [thread:$0]  %s27_s19, 256, %s29_s21, [#allocation6], %s201_s22, %s201_s22, %s202_s23  }
   0x8   :  { %193 = dma.done.wait [#allocation3], 32  }
   0x9   :  { %194 = vsyncadd [#allocation3], 4294967264 }
   0xa   :  { %195 = dma.done.wait [#allocation6], 256  }
   0xb   :  { %196 = vsyncadd [#allocation6], 4294967040  ;;  %v114_v0 = vld [vmem:[#allocation5 + $0x8] sm:$0xff]  ;;  %v113_v1 = vld [vmem:[#allocation5] sm:$0xff]  ;;  %vm68_vm0 = vcmask 261120   ;;  %s203_s24 = smov [#allocation7]  }
   0xc   :  { %78 = vmatpush.bf16.msra.mxu0 %v114_v0  ;;  %v46_v2 = vld [vmem:[#allocation2] sm:$0x3]  ;;  %s91_s25 = sshll.u32 %s203_s24, 4  ;;  %s93_s28 = sshll.u32 %s239_s3, 4  ;;  %s92_s25 = int_to_ptr.vmem [resolvable:$true] %s91_s25  ;;  %s94_s28 = int_to_ptr.hbm [resolvable:$true] %s93_s28 }
   0xd   :  { %v47_v3 = vpack.c.bf16 %v46_v2, %v46_v2  ;;  %v120_v4 = vld [vmem:[%s238_s2] ss:$0 sm:$0xff] }
  0x10   :  { %79 = vmatpush.bf16.msra.mxu0 %v113_v1 }
  0x13   :  { %112 = vmatmul.msk.bf16.vlgmr.msra.gmra.mxu0 %vm68_vm0, %v47_v3 }
  0x90   :  { %v81_v5 = vpop.f32.mrf.mxu0 }
  0x91   :  { %v82_v6 = vadd.f32 %v120_v4, %v81_v5 }
  0x93   :  { %85 = vst [vmem:[#allocation7] sm:$0x3] %v82_v6 }
  0x94   :  { %96 = dma.vmem_to_hbm [thread:$0]  %s92_s25, 32, %s94_s28, [#allocation4]  }
  0x98   :  { %v83_v7 = vpop.f32.mrf.mxu0 }
  0x99   :  { %197 = dma.done.wait [#allocation4], 32  }
  0x9a   :  { %198 = vsyncadd [#allocation4], 4294967264 }
  0x9b   :  { %101 = vsyncpa [#allocation3], 1 }
  0x9c   :  { %102 = vsyncpa [#allocation6], 1 }
  0x9d   :  { %103 = vsyncpa [#allocation4], 1 }

</bundles_post_ra>
